<compile_context>
chip_gen: v7x
topology: tpu7x:2x2x1
jax: 0.10.0
libtpu: 0.0.40
codegen_flags: <defaults>
</compile_context>

<pallas_src>
import functools

import jax
import jax.numpy as jnp
from jax import lax
from jax.experimental import pallas as pl
from jax.experimental.pallas import tpu as pltpu

NEG = -1e30  # stand-in for -inf; exp(NEG - m) underflows to exactly 0.0


def _nt(a, b):
    """a:(m,h) contracted with b:(n,h) -> (m,n) == a @ b.T, f32 accumulation."""
    return lax.dot_general(a, b, (((1,), (1,)), ((), ())),
                           preferred_element_type=jnp.float32)


def _pcl_kernel(s1_ref, s2_ref, intent_ref, idr_ref, idc_ref, o_ref,
                s11_1_ref, s11_2_ref, *, inv_temperature):
    c = pl.program_id(0)
    inv_t = jnp.float32(inv_temperature)

    a1 = s1_ref[...]              # (B, Hp) bf16, resident across the grid
    a2 = s2_ref[...]              # (B, Hp) bf16, resident across the grid
    b = intent_ref[0]             # (B, Hp) bf16, streamed per cluster
    ids_row = idr_ref[0]          # (1, B) int32
    ids_col = idc_ref[0]          # (B, 1) int32

    B = a1.shape[0]

    # Cluster-invariant self-similarities: 2 matmuls total for the whole grid,
    # kept resident in f32 VMEM scratch.  Also zero the scalar accumulator.
    @pl.when(c == 0)
    def _():
        s11_1_ref[...] = _nt(a1, a1) * inv_t
        s11_2_ref[...] = _nt(a2, a2) * inv_t
        o_ref[...] = jnp.zeros_like(o_ref)

    # Same-intent mask; eye via 2-D iota (no data movement).
    mask = ids_col == ids_row                                        # (B, B)
    eye = (lax.broadcasted_iota(jnp.int32, (B, B), 0)
           == lax.broadcasted_iota(jnp.int32, (B, B), 1))
    mask_nd = jnp.logical_and(mask, jnp.logical_not(eye))            # diag kept

    # sim22 only depends on the intent -> one matmul, shared by both samples.
    # It is symmetric (b@b.T with a symmetric mask), so its row reductions
    # equal its column reductions (lane layout, reused below).
    s22m = jnp.where(mask, NEG, _nt(b, b) * inv_t)                   # (B, B)
    s22_cmax = jnp.max(s22m, axis=0, keepdims=True)                  # (1, B)

    def sample_total(a, s11_scaled):
        s12 = _nt(a, b) * inv_t                                      # (B, B)
        s12m = jnp.where(mask_nd, NEG, s12)
        s11m = jnp.where(mask, NEG, s11_scaled)

        # CE rows 0..B-1 : logsumexp over [s12m | s11m]  (row reductions).
        m1 = jnp.maximum(jnp.max(s12m, axis=-1, keepdims=True),
                         jnp.max(s11m, axis=-1, keepdims=True))      # (B, 1)
        l1 = m1 + jnp.log(
            jnp.sum(jnp.exp(s12m - m1), axis=-1, keepdims=True)
            + jnp.sum(jnp.exp(s11m - m1), axis=-1, keepdims=True))   # (B, 1)

        # CE rows B..2B-1 : logsumexp over [s22m | s12m.T].  Column reductions
        # of s12m give the transposed half; s22m's symmetry gives its rows in
        # the same (1, B) lane layout -> no extra matmul, no transpose.
        m2 = jnp.maximum(s22_cmax,
                         jnp.max(s12m, axis=0, keepdims=True))       # (1, B)
        l2 = m2 + jnp.log(
            jnp.sum(jnp.exp(s22m - m2), axis=0, keepdims=True)
            + jnp.sum(jnp.exp(s12m - m2), axis=0, keepdims=True))    # (1, B)

        # Positive logit = diag(sim12) (never masked); it is subtracted once in
        # each CE half, and only its sum is needed -> direct row-wise dot.
        diag_sum = jnp.sum(a.astype(jnp.float32)
                           * b.astype(jnp.float32)) * inv_t
        return jnp.sum(l1) + jnp.sum(l2) - 2.0 * diag_sum

    total = sample_total(a1, s11_1_ref[...]) + sample_total(a2, s11_2_ref[...])
    o_ref[...] += total


def pc_loss(batch_sample_one, batch_sample_two, intents, intent_ids=None, *,
            temperature=1.0):
    """JAX/Pallas equivalent of PCLoss.forward (scalar f32 loss).

    batch_sample_one/two: (B, H); intents: (C, B, H); intent_ids: (C, B) or None.
    """
    B, H = batch_sample_one.shape
    C = intents.shape[0]

    # Zero-pad the hidden dim to a lane-aligned multiple of 128 (exact — zeros
    # do not change any dot product) and feed the MXU in bf16.
    Hp = ((H + 127) // 128) * 128

    def prep(x):
        x = x.astype(jnp.float32)
        if Hp != H:
            pad = [(0, 0)] * (x.ndim - 1) + [(0, Hp - H)]
            x = jnp.pad(x, pad)
        return x.astype(jnp.bfloat16)

    s1 = prep(batch_sample_one)
    s2 = prep(batch_sample_two)
    intents_p = prep(intents)

    if intent_ids is None:
        # Diagonal-only masking == every sample has a distinct intent id.
        intent_ids = jnp.broadcast_to(jnp.arange(B, dtype=jnp.int32)[None, :],
                                      (C, B))
    intent_ids = intent_ids.astype(jnp.int32)
    ids_row = intent_ids.reshape(C, 1, B)   # lane layout (for (1,B) broadcast)
    ids_col = intent_ids.reshape(C, B, 1)   # sublane layout (no in-kernel transpose)

    kernel = functools.partial(_pcl_kernel, inv_temperature=1.0 / temperature)

    cost = pl.CostEstimate(
        flops=int(2 * B * B * Hp * (3 * C + 2)),   # 3 matmuls/cluster + 2 hoisted
        transcendentals=int(C * 8 * B * B),        # exp in the row/col lse
        bytes_accessed=int(2 * (2 * B * Hp) + C * (2 * B * Hp + 8 * B) + 4),
    )

    # Rough VMEM budget: resident bf16 inputs (double-buffered), streamed
    # intents, 2x (B,B) f32 scratch, ~10 live (B,B) f32 temporaries.
    vmem_est = 12 * B * Hp + 48 * B * B + (2 << 20)
    vmem_limit = int(min(max(vmem_est, 32 << 20), 100 << 20))

    out = pl.pallas_call(
        kernel,
        out_shape=jax.ShapeDtypeStruct((1, 1), jnp.float32),
        grid_spec=pltpu.PrefetchScalarGridSpec(
            num_scalar_prefetch=0,
            grid=(C,),
            in_specs=[
                pl.BlockSpec((B, Hp), lambda c: (0, 0)),        # sample one (resident)
                pl.BlockSpec((B, Hp), lambda c: (0, 0)),        # sample two (resident)
                pl.BlockSpec((1, B, Hp), lambda c: (c, 0, 0)),  # intents[c]
                pl.BlockSpec((1, 1, B), lambda c: (c, 0, 0)),   # intent ids (row)
                pl.BlockSpec((1, B, 1), lambda c: (c, 0, 0)),   # intent ids (col)
            ],
            out_specs=pl.BlockSpec((1, 1), lambda c: (0, 0)),   # resident scalar acc
            scratch_shapes=[pltpu.VMEM((B, B), jnp.float32),    # sim11 (sample one)
                            pltpu.VMEM((B, B), jnp.float32)],   # sim11 (sample two)
        ),
        compiler_params=pltpu.CompilerParams(
            dimension_semantics=("arbitrary",),  # output accumulated across clusters
            vmem_limit_bytes=vmem_limit,
        ),
        cost_estimate=cost,
    )(s1, s2, intents_p, ids_row, ids_col)

    # Each NCE = mean over 2B CE rows; PCLoss = sum over clusters of
    # (nce_one + nce_two) / (2C)  =>  accumulated_row_sum / (2B * 2C).
    return out[0, 0] / jnp.float32(4 * B * C)


# ------------------------- pure-JAX reference -------------------------------
def _nce_ref(a, b, ids, temperature):
    sim11 = jnp.matmul(a, a.T) / temperature
    sim22 = jnp.matmul(b, b.T) / temperature
    sim12 = jnp.matmul(a, b.T) / temperature
    d = sim12.shape[-1]
    mask = ids[:, None] == ids[None, :]
    eye = jnp.eye(d, dtype=bool)
    sim11 = jnp.where(mask, -jnp.inf, sim11)
    sim22 = jnp.where(mask, -jnp.inf, sim22)
    sim12 = jnp.where(mask & ~eye, -jnp.inf, sim12)
    logits = jnp.concatenate(
        [jnp.concatenate([sim12, sim11], axis=-1),
         jnp.concatenate([sim22, sim12.T], axis=-1)], axis=-2)
    labels = jnp.arange(2 * d)
    lse = jax.scipy.special.logsumexp(logits, axis=-1)
    return jnp.mean(lse - logits[labels, labels])


def _pcl_ref(s1, s2, intents, intent_ids, temperature):
    C = intents.shape[0]
    total = jnp.float32(0.0)
    for c in range(C):
        ids = (intent_ids[c] if intent_ids is not None
               else jnp.arange(s1.shape[0]))
        total = total + _nce_ref(s1, intents[c], ids, temperature)
        total = total + _nce_ref(s2, intents[c], ids, temperature)
    return total / (2 * C)


if __name__ == "__main__":
    key = jax.random.PRNGKey(0)
    B, H, C = 8, 32, 2            # batch, hidden, num_clusters (small demo)
    temperature = 0.5

    k1, k2, k3, k4 = jax.random.split(key, 4)
    s1 = jax.random.normal(k1, (B, H), dtype=jnp.float32)
    s2 = jax.random.normal(k2, (B, H), dtype=jnp.float32)
    intents = jax.random.normal(k3, (C, B, H), dtype=jnp.float32)
    # L2-normalize (as the ICLRec pipeline effectively feeds) for tame logits.
    s1 = s1 / jnp.linalg.norm(s1, axis=-1, keepdims=True)
    s2 = s2 / jnp.linalg.norm(s2, axis=-1, keepdims=True)
    intents = intents / jnp.linalg.norm(intents, axis=-1, keepdims=True)
    intent_ids = jax.random.randint(k4, (C, B), 0, 4, dtype=jnp.int32)

    # intent_ids path
    loss = jax.block_until_ready(
        pc_loss(s1, s2, intents, intent_ids, temperature=temperature))
    ref = _pcl_ref(s1, s2, intents, intent_ids, temperature)
    assert jnp.isfinite(loss), "non-finite loss"
    # Tolerance covers bf16 MXU inputs (f32 accumulation) vs XLA f32 reference.
    assert jnp.allclose(loss, ref, atol=3e-2, rtol=2e-2), (loss, ref)

    # intent_ids = None path (diagonal-only masking)
    loss_none = jax.block_until_ready(
        pc_loss(s1, s2, intents, None, temperature=temperature))
    ref_none = _pcl_ref(s1, s2, intents, None, temperature)
    assert jnp.allclose(loss_none, ref_none, atol=3e-2, rtol=2e-2), (
        loss_none, ref_none)

    print("KERNEL_OK")
</pallas_src>

<mosaic_0001>
module attributes {stable_mosaic.version = 11 : i64} {
  func.func @_pcl_kernel(%arg0: i32, %arg1: memref<8x128xbf16, #tpu.memory_space<vmem>>, %arg2: memref<8x128xbf16, #tpu.memory_space<vmem>>, %arg3: memref<1x8x128xbf16, #tpu.memory_space<vmem>>, %arg4: memref<1x1x8xi32, #tpu.memory_space<vmem>>, %arg5: memref<1x8x1xi32, #tpu.memory_space<vmem>>, %arg6: memref<1x1xf32, #tpu.memory_space<vmem>>, %arg7: memref<8x8xf32, #tpu.memory_space<vmem>>, %arg8: memref<8x8xf32, #tpu.memory_space<vmem>>) attributes {dimension_semantics = [#tpu.dimension_semantics<arbitrary>], iteration_bounds = array<i64: 2>, scalar_prefetch = 0 : i64, scratch_operands = 2 : i64, tpu.core_type = #tpu.core_type<tc>, window_params = [{pipeline_mode = #tpu.pipeline_mode<synchronous>, transform_indices = @transform_0, window_bounds = array<i64: 8, 128>}, {pipeline_mode = #tpu.pipeline_mode<synchronous>, transform_indices = @transform_1, window_bounds = array<i64: 8, 128>}, {transform_indices = @transform_2, window_bounds = array<i64: 1, 8, 128>}, {transform_indices = @transform_3, window_bounds = array<i64: 1, 1, 8>}, {transform_indices = @transform_4, window_bounds = array<i64: 1, 8, 1>}, {pipeline_mode = #tpu.pipeline_mode<synchronous>, transform_indices = @transform_5, window_bounds = array<i64: 1, 1>}]} {
    %c0 = arith.constant 0 : index
    %c0_0 = arith.constant 0 : index
    %0 = vector.load %arg1[%c0, %c0_0] : memref<8x128xbf16, #tpu.memory_space<vmem>>, vector<8x128xbf16>
    %c0_1 = arith.constant 0 : index
    %c0_2 = arith.constant 0 : index
    %1 = vector.load %arg2[%c0_1, %c0_2] : memref<8x128xbf16, #tpu.memory_space<vmem>>, vector<8x128xbf16>
    %c0_3 = arith.constant 0 : index
    %c0_4 = arith.constant 0 : index
    %c0_5 = arith.constant 0 : index
    %2 = vector.load %arg3[%c0_3, %c0_4, %c0_5] : memref<1x8x128xbf16, #tpu.memory_space<vmem>>, vector<1x8x128xbf16>
    %3 = vector.shape_cast %2 : vector<1x8x128xbf16> to vector<8x128xbf16>
    %c0_6 = arith.constant 0 : index
    %c0_7 = arith.constant 0 : index
    %c0_8 = arith.constant 0 : index
    %4 = vector.load %arg4[%c0_6, %c0_7, %c0_8] : memref<1x1x8xi32, #tpu.memory_space<vmem>>, vector<1x1x8xi32>
    %5 = vector.shape_cast %4 : vector<1x1x8xi32> to vector<1x8xi32>
    %c0_9 = arith.constant 0 : index
    %c0_10 = arith.constant 0 : index
    %c0_11 = arith.constant 0 : index
    %6 = vector.load %arg5[%c0_9, %c0_10, %c0_11] : memref<1x8x1xi32, #tpu.memory_space<vmem>>, vector<1x8x1xi32>
    %7 = vector.shape_cast %6 : vector<1x8x1xi32> to vector<8x1xi32>
    %c0_i32 = arith.constant 0 : i32
    %8 = arith.cmpi eq, %arg0, %c0_i32 : i32
    %9 = arith.extui %8 : i1 to i32
    %cst = arith.constant 2.000000e+00 : f32
    %c0_i32_12 = arith.constant 0 : i32
    %10 = arith.cmpi ne, %9, %c0_i32_12 : i32
    scf.if %10 {
      %cst_58 = arith.constant dense<0.000000e+00> : vector<8x8xf32>
      %153 = tpu.matmul %0, %0, %cst_58 {dimension_numbers = #tpu.dot_dimension_numbers<[1], [1], [0], [0], [0, 0, 1, 0], [], []>} : vector<8x128xbf16>, vector<8x128xbf16>, vector<8x8xf32> -> vector<8x8xf32>
      %154 = vector.broadcast %cst : f32 to vector<8x8xf32>
      %155 = arith.mulf %153, %154 : vector<8x8xf32>
      %c0_59 = arith.constant 0 : index
      %c0_60 = arith.constant 0 : index
      %156 = vector.load %arg7[%c0_59, %c0_60] : memref<8x8xf32, #tpu.memory_space<vmem>>, vector<8x8xf32>
      tpu.vector_store %arg7[%c0_59, %c0_60], %155 {strides = array<i32>} : memref<8x8xf32, #tpu.memory_space<vmem>>, vector<8x8xf32>,
      %cst_61 = arith.constant dense<0.000000e+00> : vector<8x8xf32>
      %157 = tpu.matmul %1, %1, %cst_61 {dimension_numbers = #tpu.dot_dimension_numbers<[1], [1], [0], [0], [0, 0, 1, 0], [], []>} : vector<8x128xbf16>, vector<8x128xbf16>, vector<8x8xf32> -> vector<8x8xf32>
      %158 = vector.broadcast %cst : f32 to vector<8x8xf32>
      %159 = arith.mulf %157, %158 : vector<8x8xf32>
      %c0_62 = arith.constant 0 : index
      %c0_63 = arith.constant 0 : index
      %160 = vector.load %arg8[%c0_62, %c0_63] : memref<8x8xf32, #tpu.memory_space<vmem>>, vector<8x8xf32>
      tpu.vector_store %arg8[%c0_62, %c0_63], %159 {strides = array<i32>} : memref<8x8xf32, #tpu.memory_space<vmem>>, vector<8x8xf32>,
      %cst_64 = arith.constant 0.000000e+00 : f32
      %161 = vector.broadcast %cst_64 : f32 to vector<1x1xf32>
      %c0_65 = arith.constant 0 : index
      %c0_66 = arith.constant 0 : index
      %162 = vector.load %arg6[%c0_65, %c0_66] : memref<1x1xf32, #tpu.memory_space<vmem>>, vector<1x1xf32>
      tpu.vector_store %arg6[%c0_65, %c0_66], %161 {strides = array<i32>} : memref<1x1xf32, #tpu.memory_space<vmem>>, vector<1x1xf32>,
    } else {
    }
    %11 = vector.broadcast %7 : vector<8x1xi32> to vector<8x8xi32>
    %12 = vector.broadcast %5 : vector<1x8xi32> to vector<8x8xi32>
    %13 = arith.cmpi eq, %11, %12 : vector<8x8xi32>
    %14 = tpu.iota {dimensions = array<i32: 0>} : vector<8x8xi32>
    %15 = tpu.iota {dimensions = array<i32: 1>} : vector<8x8xi32>
    %16 = arith.cmpi eq, %14, %15 : vector<8x8xi32>
    %cst_13 = arith.constant dense<true> : vector<8x8xi1>
    %17 = arith.xori %16, %cst_13 : vector<8x8xi1>
    %18 = arith.andi %13, %17 : vector<8x8xi1>
    %cst_14 = arith.constant dense<0.000000e+00> : vector<8x8xf32>
    %19 = tpu.matmul %3, %3, %cst_14 {dimension_numbers = #tpu.dot_dimension_numbers<[1], [1], [0], [0], [0, 0, 1, 0], [], []>} : vector<8x128xbf16>, vector<8x128xbf16>, vector<8x8xf32> -> vector<8x8xf32>
    %cst_15 = arith.constant 2.000000e+00 : f32
    %20 = vector.broadcast %cst_15 : f32 to vector<8x8xf32>
    %21 = arith.mulf %19, %20 : vector<8x8xf32>
    %cst_16 = arith.constant -1.000000e+30 : f32
    %22 = vector.broadcast %cst_16 : f32 to vector<8x8xf32>
    %23 = arith.select %13, %22, %21 : vector<8x8xi1>, vector<8x8xf32>
    %cst_17 = arith.constant dense<0xFF800000> : vector<8xf32>
    %24 = vector.multi_reduction <maximumf>, %23, %cst_17 [0] : vector<8x8xf32> to vector<8xf32>
    %25 = vector.shape_cast %24 : vector<8xf32> to vector<1x8xf32>
    %c0_18 = arith.constant 0 : index
    %c0_19 = arith.constant 0 : index
    %26 = vector.load %arg7[%c0_18, %c0_19] : memref<8x8xf32, #tpu.memory_space<vmem>>, vector<8x8xf32>
    %cst_20 = arith.constant dense<0.000000e+00> : vector<8x8xf32>
    %27 = tpu.matmul %0, %3, %cst_20 {dimension_numbers = #tpu.dot_dimension_numbers<[1], [1], [0], [0], [0, 0, 1, 0], [], []>} : vector<8x128xbf16>, vector<8x128xbf16>, vector<8x8xf32> -> vector<8x8xf32>
    %cst_21 = arith.constant 2.000000e+00 : f32
    %28 = vector.broadcast %cst_21 : f32 to vector<8x8xf32>
    %29 = arith.mulf %27, %28 : vector<8x8xf32>
    %cst_22 = arith.constant -1.000000e+30 : f32
    %30 = vector.broadcast %cst_22 : f32 to vector<8x8xf32>
    %31 = arith.select %18, %30, %29 : vector<8x8xi1>, vector<8x8xf32>
    %cst_23 = arith.constant -1.000000e+30 : f32
    %32 = vector.broadcast %cst_23 : f32 to vector<8x8xf32>
    %33 = arith.select %13, %32, %26 : vector<8x8xi1>, vector<8x8xf32>
    %cst_24 = arith.constant dense<0xFF800000> : vector<8xf32>
    %34 = vector.multi_reduction <maximumf>, %31, %cst_24 [1] : vector<8x8xf32> to vector<8xf32>
    %35 = vector.shape_cast %34 : vector<8xf32> to vector<8x1xf32>
    %cst_25 = arith.constant dense<0xFF800000> : vector<8xf32>
    %36 = vector.multi_reduction <maximumf>, %33, %cst_25 [1] : vector<8x8xf32> to vector<8xf32>
    %37 = vector.shape_cast %36 : vector<8xf32> to vector<8x1xf32>
    %38 = arith.maximumf %35, %37 : vector<8x1xf32>
    %39 = vector.broadcast %38 : vector<8x1xf32> to vector<8x8xf32>
    %40 = arith.subf %31, %39 : vector<8x8xf32>
    %41 = math.exp %40 : vector<8x8xf32>
    %cst_26 = arith.constant dense<0.000000e+00> : vector<8xf32>
    %42 = vector.multi_reduction <add>, %41, %cst_26 [1] : vector<8x8xf32> to vector<8xf32>
    %43 = vector.shape_cast %42 : vector<8xf32> to vector<8x1xf32>
    %44 = vector.broadcast %38 : vector<8x1xf32> to vector<8x8xf32>
    %45 = arith.subf %33, %44 : vector<8x8xf32>
    %46 = math.exp %45 : vector<8x8xf32>
    %cst_27 = arith.constant dense<0.000000e+00> : vector<8xf32>
    %47 = vector.multi_reduction <add>, %46, %cst_27 [1] : vector<8x8xf32> to vector<8xf32>
    %48 = vector.shape_cast %47 : vector<8xf32> to vector<8x1xf32>
    %49 = arith.addf %43, %48 : vector<8x1xf32>
    %50 = math.log %49 : vector<8x1xf32>
    %51 = arith.addf %38, %50 : vector<8x1xf32>
    %cst_28 = arith.constant dense<0xFF800000> : vector<8xf32>
    %52 = vector.multi_reduction <maximumf>, %31, %cst_28 [0] : vector<8x8xf32> to vector<8xf32>
    %53 = vector.shape_cast %52 : vector<8xf32> to vector<1x8xf32>
    %54 = arith.maximumf %25, %53 : vector<1x8xf32>
    %55 = vector.broadcast %54 : vector<1x8xf32> to vector<8x8xf32>
    %56 = arith.subf %23, %55 : vector<8x8xf32>
    %57 = math.exp %56 : vector<8x8xf32>
    %cst_29 = arith.constant dense<0.000000e+00> : vector<8xf32>
    %58 = vector.multi_reduction <add>, %57, %cst_29 [0] : vector<8x8xf32> to vector<8xf32>
    %59 = vector.shape_cast %58 : vector<8xf32> to vector<1x8xf32>
    %60 = vector.broadcast %54 : vector<1x8xf32> to vector<8x8xf32>
    %61 = arith.subf %31, %60 : vector<8x8xf32>
    %62 = math.exp %61 : vector<8x8xf32>
    %cst_30 = arith.constant dense<0.000000e+00> : vector<8xf32>
    %63 = vector.multi_reduction <add>, %62, %cst_30 [0] : vector<8x8xf32> to vector<8xf32>
    %64 = vector.shape_cast %63 : vector<8xf32> to vector<1x8xf32>
    %65 = arith.addf %59, %64 : vector<1x8xf32>
    %66 = math.log %65 : vector<1x8xf32>
    %67 = arith.addf %54, %66 : vector<1x8xf32>
    %68 = arith.extf %0 : vector<8x128xbf16> to vector<8x128xf32>
    %69 = arith.extf %3 : vector<8x128xbf16> to vector<8x128xf32>
    %70 = arith.mulf %68, %69 : vector<8x128xf32>
    %71 = vector.shape_cast %70 : vector<8x128xf32> to vector<1x8x128xf32>
    %cst_31 = arith.constant dense<0.000000e+00> : vector<1xf32>
    %72 = vector.multi_reduction <add>, %71, %cst_31 [1, 2] : vector<1x8x128xf32> to vector<1xf32>
    %73 = vector.shape_cast %72 : vector<1xf32> to vector<1x1x1xf32>
    %74 = vector.extract %73[0, 0, 0] : f32 from vector<1x1x1xf32>
    %cst_32 = arith.constant 2.000000e+00 : f32
    %75 = arith.mulf %74, %cst_32 : f32
    %76 = vector.shape_cast %51 : vector<8x1xf32> to vector<1x8x1xf32>
    %cst_33 = arith.constant dense<0.000000e+00> : vector<1xf32>
    %77 = vector.multi_reduction <add>, %76, %cst_33 [1, 2] : vector<1x8x1xf32> to vector<1xf32>
    %78 = vector.shape_cast %77 : vector<1xf32> to vector<1x1x1xf32>
    %79 = vector.extract %78[0, 0, 0] : f32 from vector<1x1x1xf32>
    %80 = vector.shape_cast %67 : vector<1x8xf32> to vector<1x1x8xf32>
    %cst_34 = arith.constant dense<0.000000e+00> : vector<1xf32>
    %81 = vector.multi_reduction <add>, %80, %cst_34 [1, 2] : vector<1x1x8xf32> to vector<1xf32>
    %82 = vector.shape_cast %81 : vector<1xf32> to vector<1x1x1xf32>
    %83 = vector.extract %82[0, 0, 0] : f32 from vector<1x1x1xf32>
    %84 = arith.addf %79, %83 : f32
    %cst_35 = arith.constant 2.000000e+00 : f32
    %85 = arith.mulf %cst_35, %75 : f32
    %86 = arith.subf %84, %85 : f32
    %c0_36 = arith.constant 0 : index
    %c0_37 = arith.constant 0 : index
    %87 = vector.load %arg8[%c0_36, %c0_37] : memref<8x8xf32, #tpu.memory_space<vmem>>, vector<8x8xf32>
    %cst_38 = arith.constant dense<0.000000e+00> : vector<8x8xf32>
    %88 = tpu.matmul %1, %3, %cst_38 {dimension_numbers = #tpu.dot_dimension_numbers<[1], [1], [0], [0], [0, 0, 1, 0], [], []>} : vector<8x128xbf16>, vector<8x128xbf16>, vector<8x8xf32> -> vector<8x8xf32>
    %cst_39 = arith.constant 2.000000e+00 : f32
    %89 = vector.broadcast %cst_39 : f32 to vector<8x8xf32>
    %90 = arith.mulf %88, %89 : vector<8x8xf32>
    %cst_40 = arith.constant -1.000000e+30 : f32
    %91 = vector.broadcast %cst_40 : f32 to vector<8x8xf32>
    %92 = arith.select %18, %91, %90 : vector<8x8xi1>, vector<8x8xf32>
    %cst_41 = arith.constant -1.000000e+30 : f32
    %93 = vector.broadcast %cst_41 : f32 to vector<8x8xf32>
    %94 = arith.select %13, %93, %87 : vector<8x8xi1>, vector<8x8xf32>
    %cst_42 = arith.constant dense<0xFF800000> : vector<8xf32>
    %95 = vector.multi_reduction <maximumf>, %92, %cst_42 [1] : vector<8x8xf32> to vector<8xf32>
    %96 = vector.shape_cast %95 : vector<8xf32> to vector<8x1xf32>
    %cst_43 = arith.constant dense<0xFF800000> : vector<8xf32>
    %97 = vector.multi_reduction <maximumf>, %94, %cst_43 [1] : vector<8x8xf32> to vector<8xf32>
    %98 = vector.shape_cast %97 : vector<8xf32> to vector<8x1xf32>
    %99 = arith.maximumf %96, %98 : vector<8x1xf32>
    %100 = vector.broadcast %99 : vector<8x1xf32> to vector<8x8xf32>
    %101 = arith.subf %92, %100 : vector<8x8xf32>
    %102 = math.exp %101 : vector<8x8xf32>
    %cst_44 = arith.constant dense<0.000000e+00> : vector<8xf32>
    %103 = vector.multi_reduction <add>, %102, %cst_44 [1] : vector<8x8xf32> to vector<8xf32>
    %104 = vector.shape_cast %103 : vector<8xf32> to vector<8x1xf32>
    %105 = vector.broadcast %99 : vector<8x1xf32> to vector<8x8xf32>
    %106 = arith.subf %94, %105 : vector<8x8xf32>
    %107 = math.exp %106 : vector<8x8xf32>
    %cst_45 = arith.constant dense<0.000000e+00> : vector<8xf32>
    %108 = vector.multi_reduction <add>, %107, %cst_45 [1] : vector<8x8xf32> to vector<8xf32>
    %109 = vector.shape_cast %108 : vector<8xf32> to vector<8x1xf32>
    %110 = arith.addf %104, %109 : vector<8x1xf32>
    %111 = math.log %110 : vector<8x1xf32>
    %112 = arith.addf %99, %111 : vector<8x1xf32>
    %cst_46 = arith.constant dense<0xFF800000> : vector<8xf32>
    %113 = vector.multi_reduction <maximumf>, %92, %cst_46 [0] : vector<8x8xf32> to vector<8xf32>
    %114 = vector.shape_cast %113 : vector<8xf32> to vector<1x8xf32>
    %115 = arith.maximumf %25, %114 : vector<1x8xf32>
    %116 = vector.broadcast %115 : vector<1x8xf32> to vector<8x8xf32>
    %117 = arith.subf %23, %116 : vector<8x8xf32>
    %118 = math.exp %117 : vector<8x8xf32>
    %cst_47 = arith.constant dense<0.000000e+00> : vector<8xf32>
    %119 = vector.multi_reduction <add>, %118, %cst_47 [0] : vector<8x8xf32> to vector<8xf32>
    %120 = vector.shape_cast %119 : vector<8xf32> to vector<1x8xf32>
    %121 = vector.broadcast %115 : vector<1x8xf32> to vector<8x8xf32>
    %122 = arith.subf %92, %121 : vector<8x8xf32>
    %123 = math.exp %122 : vector<8x8xf32>
    %cst_48 = arith.constant dense<0.000000e+00> : vector<8xf32>
    %124 = vector.multi_reduction <add>, %123, %cst_48 [0] : vector<8x8xf32> to vector<8xf32>
    %125 = vector.shape_cast %124 : vector<8xf32> to vector<1x8xf32>
    %126 = arith.addf %120, %125 : vector<1x8xf32>
    %127 = math.log %126 : vector<1x8xf32>
    %128 = arith.addf %115, %127 : vector<1x8xf32>
    %129 = arith.extf %1 : vector<8x128xbf16> to vector<8x128xf32>
    %130 = arith.extf %3 : vector<8x128xbf16> to vector<8x128xf32>
    %131 = arith.mulf %129, %130 : vector<8x128xf32>
    %132 = vector.shape_cast %131 : vector<8x128xf32> to vector<1x8x128xf32>
    %cst_49 = arith.constant dense<0.000000e+00> : vector<1xf32>
    %133 = vector.multi_reduction <add>, %132, %cst_49 [1, 2] : vector<1x8x128xf32> to vector<1xf32>
    %134 = vector.shape_cast %133 : vector<1xf32> to vector<1x1x1xf32>
    %135 = vector.extract %134[0, 0, 0] : f32 from vector<1x1x1xf32>
    %cst_50 = arith.constant 2.000000e+00 : f32
    %136 = arith.mulf %135, %cst_50 : f32
    %137 = vector.shape_cast %112 : vector<8x1xf32> to vector<1x8x1xf32>
    %cst_51 = arith.constant dense<0.000000e+00> : vector<1xf32>
    %138 = vector.multi_reduction <add>, %137, %cst_51 [1, 2] : vector<1x8x1xf32> to vector<1xf32>
    %139 = vector.shape_cast %138 : vector<1xf32> to vector<1x1x1xf32>
    %140 = vector.extract %139[0, 0, 0] : f32 from vector<1x1x1xf32>
    %141 = vector.shape_cast %128 : vector<1x8xf32> to vector<1x1x8xf32>
    %cst_52 = arith.constant dense<0.000000e+00> : vector<1xf32>
    %142 = vector.multi_reduction <add>, %141, %cst_52 [1, 2] : vector<1x1x8xf32> to vector<1xf32>
    %143 = vector.shape_cast %142 : vector<1xf32> to vector<1x1x1xf32>
    %144 = vector.extract %143[0, 0, 0] : f32 from vector<1x1x1xf32>
    %145 = arith.addf %140, %144 : f32
    %cst_53 = arith.constant 2.000000e+00 : f32
    %146 = arith.mulf %cst_53, %136 : f32
    %147 = arith.subf %145, %146 : f32
    %148 = arith.addf %86, %147 : f32
    %c0_54 = arith.constant 0 : index
    %c0_55 = arith.constant 0 : index
    %149 = vector.load %arg6[%c0_54, %c0_55] : memref<1x1xf32, #tpu.memory_space<vmem>>, vector<1x1xf32>
    %150 = vector.broadcast %148 : f32 to vector<1x1xf32>
    %151 = arith.addf %149, %150 : vector<1x1xf32>
    %c0_56 = arith.constant 0 : index
    %c0_57 = arith.constant 0 : index
    %152 = vector.load %arg6[%c0_56, %c0_57] : memref<1x1xf32, #tpu.memory_space<vmem>>, vector<1x1xf32>
    tpu.vector_store %arg6[%c0_56, %c0_57], %151 {strides = array<i32>} : memref<1x1xf32, #tpu.memory_space<vmem>>, vector<1x1xf32>,
    return
  }
  func.func @transform_0(%arg0: i32) -> (i32, i32) {
    %c0_i32 = arith.constant 0 : i32
    %c0_i32_0 = arith.constant 0 : i32
    %c0_i32_1 = arith.constant 0 : i32
    return %c0_i32, %c0_i32_0 : i32, i32
  }
  func.func @transform_1(%arg0: i32) -> (i32, i32) {
    %c0_i32 = arith.constant 0 : i32
    %c0_i32_0 = arith.constant 0 : i32
    %c0_i32_1 = arith.constant 0 : i32
    return %c0_i32, %c0_i32_0 : i32, i32
  }
  func.func @transform_2(%arg0: i32) -> (i32, i32, i32) {
    %c0_i32 = arith.constant 0 : i32
    %c0_i32_0 = arith.constant 0 : i32
    %c0_i32_1 = arith.constant 0 : i32
    return %arg0, %c0_i32, %c0_i32_0 : i32, i32, i32
  }
  func.func @transform_3(%arg0: i32) -> (i32, i32, i32) {
    %c0_i32 = arith.constant 0 : i32
    %c0_i32_0 = arith.constant 0 : i32
    %c0_i32_1 = arith.constant 0 : i32
    return %arg0, %c0_i32, %c0_i32_0 : i32, i32, i32
  }
  func.func @transform_4(%arg0: i32) -> (i32, i32, i32) {
    %c0_i32 = arith.constant 0 : i32
    %c0_i32_0 = arith.constant 0 : i32
    %c0_i32_1 = arith.constant 0 : i32
    return %arg0, %c0_i32, %c0_i32_0 : i32, i32, i32
  }
  func.func @transform_5(%arg0: i32) -> (i32, i32) {
    %c0_i32 = arith.constant 0 : i32
    %c0_i32_0 = arith.constant 0 : i32
    %c0_i32_1 = arith.constant 0 : i32
    return %c0_i32, %c0_i32_0 : i32, i32
  }
}

</mosaic_0001>

<bundles_post_ra>
// kernel: tpu_custom_call.1
= control target key start
LH: loop header
LB: loop body
LE: loop exit
PB: predicated region body
PF: predicated region fallthrough
CT: control target
= control target key end

     0   :  { %10 = vsyncpa [#allocation5], 0  ;;  %s928_s18 = smov 0   ;;  %s1051_s0 = inlined_call_operand.vmem [shape: bf16[8,128], index: 0, kind: input, shape index: {}]   ;;  %s1052_s1 = inlined_call_operand.vmem [shape: bf16[8,128], index: 1, kind: input, shape index: {}]   ;;  %s1053_s2 = inlined_call_operand.vmem [shape: bf16[2,8,128], index: 2, kind: input, shape index: {}]   ;;  %s1054_s3 = inlined_call_operand.vmem [shape: s32[2,1,8], index: 3, kind: input, shape index: {}]   ;;  %s1055_s4 = inlined_call_operand.vmem [shape: s32[2,8,1], index: 4, kind: input, shape index: {}]   ;;  %s1056_s5 = inlined_call_operand.hbm [shape: f32[1,1], index: 5, kind: output, shape index: {}]  }
   0x1 LB: > { %s934_s19 = sadd.s32 4294967295, %s889_s18   ;;  %p746_p0 = scmp.ge.s32.totalorder %s889_s18, 1  ;;  %s889_s18 = sphi %s928_s18, %s16_s18  }
   0x2   : > { %p199_p1 = scmp.lt.s32.totalorder %s889_s18, 3 }
   0x4   : > { %p200_p2 = pnand %p746_p0, %p199_p1 }
   0x5   : > { %p228_p3 = scmp.lt.s32.totalorder (!%p200_p2), %s934_s19, 1  ;;  %v942_v0 = vld [vmem:[%s1051_s0] sm:$0xf] (!%p200_p2)  ;;  %p749_p4 = scmp.ne.s32.totalorder (!%p200_p2), %s934_s19, 0 }
   0x6   : > { %203 = sbr.rel (%p200_p2) target bundleno = 1028 (0x404), region = 40  ;;  %v947_v1 = vld [vmem:[%s1052_s1] sm:$0xf] (!%p200_p2) }
   0xd   : > { %s229_s24 = scalar_select %p228_p3, %s934_s19, 1 }
   0xe   : > { %248 = sbr.rel (%p749_p4) target bundleno = 238 (0xee), region = 44  ;;  %vm334_vm0 = vcmask (!%p749_p4), 0   ;;  %v891_v5 = vmov (!%p749_p4), 0.0   ;;  %vm892_vm1 = vmmov (!%p749_p4), 0   ;;  %vm290_vm2 = vcmask (!%p749_p4), 64512  }
   0xf   : > { %s747_s25 = sshll.u32 %s229_s24, 2  ;;  %s234_s28 = scalar_lea.vmem %s1054_s3, %s229_s24  ;;  %765 = vmatprep.subr.bf16.mxu0 (!%p749_p4), %v891_v5  ;;  %335 = vst.msk [vmem:[#allocation4] sm:$0x1] (!%p749_p4), %vm334_vm0, %v891_v5  ;;  %771 = vmatprep.subr.bf16.mxu1 (!%p749_p4), %v891_v5 }
  0x10   : > { %s231_s6 = scalar_lea.vmem %s1053_s2, %s747_s25  ;;  %s748_s7 = sshll.u32 %s229_s24, 3  ;;  %v956_v2 = vld [vmem:[%s234_s28] ss:$0 sm:$0xff]  ;;  %766 = vmatpush3.bf16.xpose.msra.mxu0 (!%p749_p4), %v942_v0  ;;  %772 = vmatpush3.bf16.xpose.msra.mxu1 (!%p749_p4), %v947_v1 }
  0x11   : > { %s238_s10 = scalar_lea.vmem %s1055_s4, %s748_s7  ;;  %v961_v3 = vld [vmem:[%s231_s6] sm:$0xf]  ;;  %767 = vmatprep.mubr.msk.bf16.mxu0 (!%p749_p4), %vm892_vm1, %v891_v5  ;;  %773 = vmatprep.mubr.msk.bf16.mxu1 (!%p749_p4), %vm892_vm1, %v891_v5 }
  0x12   : > { %v244_v4 = vld [vmem:[%s238_s10] sm:$0xff] }
  0x17   : > { %768 = vmatmul.mubr.bf16.vlgmr.msra.gmra.mrb[0].mxu0 %v942_v0  ;;  %774 = vmatmul.mubr.bf16.vlgmr.msra.gmra.mrb[0].mxu1 %v947_v1 }
  0xea   : > { %v283_v6 = vpop.f32.mrb[0].mxu0  ;;  %v326_v7 = vpop.f32.mrb[0].mxu1 }
  0xeb   : > { %v289_v8 = vmul.f32 2.0, %v283_v6  ;;  %v332_v9 = vmul.f32 2.0, %v326_v7  ;;  %v769_v10 = vpop.f32.mrb[1].mxu0  ;;  %v775_v11 = vpop.f32.mrb[1].mxu1 }
  0xec   : > { %v286_v12 = vpop.f32.mrb[2].mxu0  ;;  %v329_v13 = vpop.f32.mrb[2].mxu1 }
  0xed   : > { %291 = vst.msk [vmem:[#allocation2] sm:$0xff] %vm290_vm2, %v289_v8  ;;  %333 = vst.msk [vmem:[#allocation3] sm:$0xff] %vm290_vm2, %v332_v9  ;;  %v770_v14 = vpop.f32.mrb[3].mxu0  ;;  %v776_v15 = vpop.f32.mrb[3].mxu1 }
  0xee PF: > { %v893_v16 = vmov 0.0   ;;  %vm894_vm3 = vmmov 0   ;;  %v895_v17 = vmov 0   ;;  %vm393_vm4 = vcmask 64512   ;;  %s897_s28 = smov [#allocation4]   ;;  %p811_p5 = scmp.eq.s32.totalorder %s934_s19, 1 }
  0xef   : > { %777 = vmatprep.subr.bf16.mxu0 %v893_v16  ;;  %783 = vmatprep.subr.bf16.mxu1 %v893_v16  ;;  %v344_v22 = vlaneseq  ;;  %vm896_vm7 = vmmov 1   ;;  %vm523_vm10 = vcmask 57344   ;;  %vm512_vm11 = vcmask 7168   ;;  %s683_s29 = sshll.u32 %s897_s28, 4  ;;  %s684_s29 = int_to_ptr.vmem [resolvable:$true] %s683_s29 }
  0xf0   : > { %778 = vmatpush3.bf16.xpose.msra.mxu0 %v961_v3  ;;  %784 = vmatpush3.bf16.xpose.msra.mxu1 %v961_v3  ;;  %vm674_vm12 = vcmask 0   ;;  %s853_s30 = scalar_lea.vmem %s684_s29, 16  ;;  %s859_s6 = scalar_lea.vmem %s684_s29, 32 }
  0xf1   : > { %779 = vmatprep.mubr.msk.bf16.mxu0 %vm894_vm3, %v893_v16  ;;  %785 = vmatprep.mubr.msk.bf16.mxu1 %vm894_vm3, %v893_v16  ;;  %v345_v23 = vshrl.u32 %v344_v22, 7  ;;  %v347_v24 = vand.u32 127, %v344_v22  ;;  %p854_p6 = scmp.ne.s32.totalorder %s684_s29, %s853_s30  ;;  %p860_p9 = scmp.lt.s32.totalorder %s684_s29, %s684_s29 }
  0xf2   : > { %789 = vmatprep.subr.bf16.mxu0 %v893_v16  ;;  %828 = vset.pattern.permute.xlu0 %v895_v17  ;;  %p861_p10 = scmp.lt.s32.totalorder %s859_s6, %s853_s30 }
  0xf3   : > { %337 = vperm.xlu0 %828, %v244_v4   ;;  %vm348_vm6 = vcmp.eq.s32.totalorder %v345_v23, %v347_v24  ;;  %p855_p7 = pnand %p854_p6, %p811_p5 }
  0xf4   : > { %v401_v18 = vld [vmem:[#allocation2] sm:$0xff]  ;;  %vm349_vm8 = vmxor %vm348_vm6, %vm896_vm7  ;;  %v537_v50 = vld [vmem:[#allocation3] sm:$0xff]  ;;  %p862_p11 = por %p861_p10, %p860_p9 }
  0xf5   : > { %p856_p8 = pneg %p855_p7 }
  0xf7   : > { %780 = vmatmul.mubr.bf16.vlgmr.msra.gmra.mrb[0].mxu0 %v961_v3  ;;  %786 = vmatmul.mubr.bf16.vlgmr.msra.gmra.mrb[0].mxu1 %v942_v0  ;;  %p863_p12 = pnand %p862_p11, %p856_p8 }
  0xf8   : > { %790 = vmatpush3.bf16.xpose.msra.mxu0 %v961_v3  ;;  %791 = vmatprep.mubr.msk.bf16.mxu0 %vm894_vm3, %v893_v16 }
  0xff   : > { %792 = vmatmul.mubr.bf16.vlgmr.msra.gmra.mrb[4].mxu0 %v947_v1 }
 0x172   : > { %v338_v19 = vpop.permute.xlu0 %337 }
 0x173   : > { %vm343_vm5 = vcmp.eq.s32.totalorder %v338_v19, %v956_v2 }
 0x174   : > { %v977_v20 = vsel %vm343_vm5, -1e+30, %v401_v18  ;;  %vm983_vm9 = vmand %vm343_vm5, %vm349_vm8  ;;  %v1004_v59 = vsel %vm343_vm5, -1e+30, %v537_v50 }
 0x175   : > { %v448_v21 = vsel %vm393_vm4, %v977_v20, -inf  ;;  %v584_v63 = vsel %vm393_vm4, %v1004_v59, -inf }
 0x176   : > { %449 = vmax.xlane.f32.xlu1 %v448_v21 }
 0x1ca   : > { %v385_v25 = vpop.f32.mrb[0].mxu0  ;;  %v436_v26 = vpop.f32.mrb[0].mxu1 }
 0x1cb   : > { %v391_v28 = vmul.f32 2.0, %v385_v25  ;;  %v442_v29 = vmul.f32 2.0, %v436_v26  ;;  %v781_v30 = vpop.f32.mrb[1].mxu0  ;;  %v787_v31 = vpop.f32.mrb[1].mxu1 }
 0x1cc   : > { %v388_v32 = vpop.f32.mrb[2].mxu0  ;;  %v439_v33 = vpop.f32.mrb[2].mxu1 }
 0x1cd   : > { %v392_v34 = vsel %vm343_vm5, -1e+30, %v391_v28  ;;  %v782_v35 = vpop.f32.mrb[3].mxu0  ;;  %v788_v36 = vpop.f32.mrb[3].mxu1  ;;  %v991_v37 = vsel %vm983_vm9, -1e+30, %v442_v29 }
 0x1ce   : > { %v394_v38 = vsel %vm393_vm4, %v392_v34, -inf  ;;  %v445_v39 = vsel %vm393_vm4, %v991_v37, -inf }
 0x1cf   : > { %v395_v40 = vrot.slane %v394_v38, 4  ;;  %446 = vmax.xlane.f32.xlu0 %v445_v39  ;;  %v468_v41 = vrot.slane %v445_v39, 4 }
 0x1d1   : > { %v396_v42 = vmax.f32 %v394_v38, %v395_v40  ;;  %v469_v43 = vmax.f32 %v445_v39, %v468_v41 }
 0x1d2   : > { %v572_v44 = vpop.f32.mrb[4].mxu0 }
 0x1d3   : > { %v397_v45 = vrot.slane %v396_v42, 2  ;;  %v470_v46 = vrot.slane %v469_v43, 2  ;;  %v578_v47 = vmul.f32 2.0, %v572_v44  ;;  %v793_v48 = vpop.f32.mrb[5].mxu0 }
 0x1d4   : > { %v575_v49 = vpop.f32.mrb[6].mxu0 }
 0x1d5   : > { %v398_v51 = vmax.f32 %v396_v42, %v397_v45  ;;  %v471_v52 = vmax.f32 %v469_v43, %v470_v46  ;;  %v998_v53 = vsel %vm983_vm9, -1e+30, %v578_v47  ;;  %v794_v54 = vpop.f32.mrb[7].mxu0 }
 0x1d6   : > { %v581_v55 = vsel %vm393_vm4, %v998_v53, -inf }
 0x1d7   : > { %v399_v56 = vrot.slane %v398_v51, 1  ;;  %v472_v57 = vrot.slane %v471_v52, 1  ;;  %582 = vmax.xlane.f32.xlu1 %v581_v55  ;;  %v604_v58 = vrot.slane %v581_v55, 4 }
 0x1d9   : > { %v400_v60 = vmax.f32 %v398_v51, %v399_v56  ;;  %v473_v61 = vmax.f32 %v471_v52, %v472_v57  ;;  %v605_v62 = vmax.f32 %v581_v55, %v604_v58 }
 0x1db   : > { %v474_v4 = vmax.f32 %v400_v60, %v473_v61  ;;  %v606_v5 = vrot.slane %v605_v62, 2  ;;  %585 = vmax.xlane.f32.xlu1 %v584_v63 }
 0x1dd   : > { %v475_v6 = vsub.f32 %v392_v34, %v474_v4  ;;  %v485_v7 = vsub.f32 %v991_v37, %v474_v4  ;;  %v607_v8 = vmax.f32 %v605_v62, %v606_v5 }
 0x1df   : > { %v476_v9 = vmul.f32 1.442695, %v475_v6  ;;  %v486_v10 = vmul.f32 1.442695, %v485_v7  ;;  %v608_v11 = vrot.slane %v607_v8, 1 }
 0x1e1   : > { %829 = vpow2.f32 %v476_v9  ;;  %v609_v2 = vmax.f32 %v607_v8, %v608_v11 }
 0x1e2   : > { %831 = vpow2.f32 %v486_v10 }
 0x1e3   : > { %v610_v12 = vmax.f32 %v400_v60, %v609_v2 }
 0x1e5   : > { %v611_v13 = vsub.f32 %v392_v34, %v610_v12  ;;  %v621_v14 = vsub.f32 %v998_v53, %v610_v12 }
 0x1e7   : > { %v612_v15 = vmul.f32 1.442695, %v611_v13  ;;  %v622_v16 = vmul.f32 1.442695, %v621_v14 }
 0x1e9   : > { %833 = vpow2.f32 %v612_v15 }
 0x1ea   : > { %835 = vpow2.f32 %v622_v16 }
 0x1eb   : > { %v830_v17 = vpop.eup %829 }
 0x1ec   : > { %v832_v18 = vpop.eup %831  ;;  %v478_v19 = vsel %vm393_vm4, %v830_v17, 0.0 }
 0x1ed   : > { %v479_v21 = vrot.slane %v478_v19, 4  ;;  %v488_v22 = vsel %vm393_vm4, %v832_v18, 0.0 }
 0x1ee   : > { %v489_v23 = vrot.slane %v488_v22, 4 }
 0x1ef   : > { %v480_v24 = vadd.f32 %v479_v21, %v478_v19 }
 0x1f0   : > { %v490_v25 = vadd.f32 %v489_v23, %v488_v22  ;;  %v500_v22 = vunpack.c.l.bf16 %v961_v3 }
 0x1f1   : > { %v481_v26 = vrot.slane %v480_v24, 2 }
 0x1f2   : > { %v491_v27 = vrot.slane %v490_v25, 2 }
 0x1f3   : > { %v834_v28 = vpop.eup %833  ;;  %v482_v29 = vadd.f32 %v481_v26, %v480_v24  ;;  %v635_v24 = vunpack.c.l.bf16 %v947_v1 }
 0x1f4   : > { %v836_v30 = vpop.eup %835  ;;  %v492_v31 = vadd.f32 %v491_v27, %v490_v25  ;;  %v614_v32 = vsel %vm393_vm4, %v834_v28, 0.0 }
 0x1f5   : > { %v483_v33 = vrot.slane %v482_v29, 1  ;;  %v615_v34 = vrot.slane %v614_v32, 4  ;;  %v624_v35 = vsel %vm393_vm4, %v836_v30, 0.0  ;;  %v636_v25 = vmul.f32 %v635_v24, %v500_v22 }
 0x1f6   : > { %v493_v36 = vrot.slane %v492_v31, 1  ;;  %v625_v38 = vrot.slane %v624_v35, 4 }
 0x1f7   : > { %v484_v39 = vadd.f32 %v483_v33, %v482_v29  ;;  %v616_v40 = vadd.f32 %v615_v34, %v614_v32 }
 0x1f8   : > { %v494_v41 = vadd.f32 %v493_v36, %v492_v31  ;;  %v626_v42 = vadd.f32 %v625_v38, %v624_v35 }
 0x1f9   : > { %v617_v43 = vrot.slane %v616_v40, 2 }
 0x1fa   : > { %v495_v44 = vadd.f32 %v494_v41, %v484_v39  ;;  %v627_v45 = vrot.slane %v626_v42, 2 }
 0x1fb   : > { %v618_v46 = vadd.f32 %v617_v43, %v616_v40 }
 0x1fc   : > { %837 = vlog2.f32 %v495_v44  ;;  %v628_v47 = vadd.f32 %v627_v45, %v626_v42 }
 0x1fd   : > { %v619_v48 = vrot.slane %v618_v46, 1 }
 0x1fe   : > { %v629_v49 = vrot.slane %v628_v47, 1 }
 0x1ff   : > { %v620_v50 = vadd.f32 %v619_v48, %v618_v46 }
 0x200   : > { %v630_v51 = vadd.f32 %v629_v49, %v628_v47 }
 0x202   : > { %v631_v52 = vadd.f32 %v630_v51, %v620_v50 }
 0x203   : > { %v450_v63 = vpop.xlane.xlu1 %449 }
 0x204   : > { %839 = vlog2.f32 %v631_v52 }
 0x206   : > { %v838_v54 = vpop.eup %837 }
 0x207   : > { %v497_v55 = vmul.f32 0.6931472, %v838_v54 }
 0x209   : > { %v498_v56 = vadd.f32 %v497_v55, %v474_v4 }
 0x20b   : > { %v524_v57 = vsel %vm523_vm10, %v498_v56, 0.0 }
 0x20c   : > { %525 = vadd.xlane.f32.xlu0 %v524_v57 }
 0x20e   : > { %v840_v58 = vpop.eup %839 }
 0x20f   : > { %v633_v60 = vmul.f32 0.6931472, %v840_v58 }
 0x211   : > { %v634_v61 = vadd.f32 %v633_v60, %v610_v12 }
 0x213   : > { %v657_v62 = vsel %vm523_vm10, %v634_v61, 0.0 }
 0x25c   : > { %v447_v5 = vpop.xlane.xlu0 %446 }
 0x25d   : > { %v451_v6 = vmax.f32 %v447_v5, %v450_v63 }
 0x25f   : > { %v452_v7 = vsub.f32 %v991_v37, %v451_v6  ;;  %v458_v8 = vsub.f32 %v977_v20, %v451_v6 }
 0x261   : > { %v453_v9 = vmul.f32 1.442695, %v452_v7  ;;  %v459_v10 = vmul.f32 1.442695, %v458_v8 }
 0x263   : > { %841 = vpow2.f32 %v453_v9 }
 0x264   : > { %v583_v11 = vpop.xlane.xlu1 %582  ;;  %843 = vpow2.f32 %v459_v10 }
 0x268   : > { %v586_v2 = vpop.xlane.xlu1 %585 }
 0x269   : > { %v587_v4 = vmax.f32 %v583_v11, %v586_v2 }
 0x26b   : > { %v588_v13 = vsub.f32 %v998_v53, %v587_v4  ;;  %v594_v14 = vsub.f32 %v1004_v59, %v587_v4  ;;  %v499_v59 = vunpack.c.l.bf16 %v942_v0 }
 0x26d   : > { %v842_v12 = vpop.eup %841  ;;  %v589_v15 = vmul.f32 1.442695, %v588_v13  ;;  %v595_v16 = vmul.f32 1.442695, %v594_v14  ;;  %v501_v23 = vmul.f32 %v500_v22, %v499_v59 }
 0x26e   : > { %v455_v17 = vsel %vm393_vm4, %v842_v12, 0.0  ;;  %v844_v18 = vpop.eup %843 }
 0x26f   : > { %845 = vpow2.f32 %v589_v15  ;;  %456 = vadd.xlane.f32.xlu1 %v455_v17  ;;  %v461_v20 = vsel %vm393_vm4, %v844_v18, 0.0 }
 0x270   : > { %847 = vpow2.f32 %v595_v16 }
 0x273   : > { %462 = vadd.xlane.f32.xlu1 %v461_v20 }
 0x279   : > { %v846_v37 = vpop.eup %845 }
 0x27a   : > { %v591_v19 = vsel %vm393_vm4, %v846_v37, 0.0  ;;  %v848_v21 = vpop.eup %847 }
 0x27b   : > { %592 = vadd.xlane.f32.xlu1 %v591_v19  ;;  %v597_v53 = vsel %vm393_vm4, %v848_v21, 0.0  ;;  %v671_v19 = vld [vmem:[#allocation4] sm:$0x1] }
 0x27f   : > { %598 = vadd.xlane.f32.xlu1 %v597_v53 }
 0x283   : > { %502 = vadd.xlane.f32.xlu1 %v501_v23 }
 0x287   : > { %637 = vadd.xlane.f32.xlu1 %v636_v25 }
 0x299   : > { %v526_v45 = vpop.xlane.xlu0 %525 }
 0x29a   : > { %v527_v46 = vrot.slane %v526_v45, 4 }
 0x29c   : > { %v528_v49 = vadd.f32 %v527_v46, %v526_v45 }
 0x29e   : > { %v529_v51 = vrot.slane %v528_v49, 2 }
 0x2a0   : > { %v530_v58 = vadd.f32 %v529_v51, %v528_v49 }
 0x2fc   : > { %v457_v26 = vpop.xlane.xlu1 %456 }
 0x300   : > { %v463_v27 = vpop.xlane.xlu1 %462 }
 0x301   : > { %v464_v28 = vadd.f32 %v463_v27, %v457_v26 }
 0x303   : > { %849 = vlog2.f32 %v464_v28 }
 0x308   : > { %v593_v29 = vpop.xlane.xlu1 %592 }
 0x30c   : > { %v599_v30 = vpop.xlane.xlu1 %598 }
 0x30d   : > { %v850_v31 = vpop.eup %849  ;;  %v600_v32 = vadd.f32 %v599_v30, %v593_v29 }
 0x30e   : > { %v466_v33 = vmul.f32 0.6931472, %v850_v31 }
 0x30f   : > { %851 = vlog2.f32 %v600_v32 }
 0x310   : > { %v467_v0 = vadd.f32 %v466_v33, %v451_v6  ;;  %v503_v35 = vpop.xlane.xlu1 %502  ;;  %v531_v6 = vrot.slane %v530_v58, 1 }
 0x311   : > { %v504_v36 = vrot.slane %v503_v35, 4 }
 0x312   : > { %v513_v34 = vsel %vm512_vm11, %v467_v0, 0.0  ;;  %v532_v2 = vadd.f32 %v531_v6, %v530_v58 }
 0x313   : > { %514 = vadd.xlane.f32.xlu1 %v513_v34  ;;  %v505_v39 = vadd.f32 %v504_v36, %v503_v35 }
 0x314   : > { %v638_v47 = vpop.xlane.xlu1 %637 }
 0x315   : > { %v506_v41 = vrot.slane %v505_v39, 2  ;;  %v639_v48 = vrot.slane %v638_v47, 4 }
 0x317   : > { %658 = vadd.xlane.f32.xlu1 %v657_v62  ;;  %v507_v42 = vadd.f32 %v506_v41, %v505_v39  ;;  %v640_v50 = vadd.f32 %v639_v48, %v638_v47 }
 0x319   : > { %v852_v3 = vpop.eup %851  ;;  %v508_v43 = vrot.slane %v507_v42, 1  ;;  %v641_v54 = vrot.slane %v640_v50, 2 }
 0x31a   : > { %v602_v1 = vmul.f32 0.6931472, %v852_v3 }
 0x31b   : > { %v509_v44 = vadd.f32 %v508_v43, %v507_v42  ;;  %v642_v62 = vadd.f32 %v641_v54, %v640_v50 }
 0x31c   : > { %v603_v38 = vadd.f32 %v602_v1, %v587_v4 }
 0x31d   : > { %795 = vpush %v509_v44  ;;  %v643_v8 = vrot.slane %v642_v62, 1 }
 0x31e   : > { %v647_v40 = vsel %vm512_vm11, %v603_v38, 0.0 }
 0x31f   : > { %648 = vadd.xlane.f32.xlu0 %v647_v40  ;;  %v644_v13 = vadd.f32 %v643_v8, %v642_v62 }
 0x34e   : > { %s796_s11 = spop %795 }
 0x34f   : > { %s511_s15 = smul.f32 2.0, %s796_s11 }
 0x351   : > { %s535_s21 = smul.f32 2.0, %s511_s15 }
 0x3a0   : > { %v515_v52 = vpop.xlane.xlu1 %514 }
 0x3a1   : > { %v516_v55 = vrot.slane %v515_v52, 4 }
 0x3a3   : > { %v517_v56 = vadd.f32 %v516_v55, %v515_v52 }
 0x3a4   : > { %v659_v57 = vpop.xlane.xlu1 %658 }
 0x3a5   : > { %v518_v60 = vrot.slane %v517_v56, 2  ;;  %v660_v61 = vrot.slane %v659_v57, 4 }
 0x3a7   : > { %v519_v63 = vadd.f32 %v518_v60, %v517_v56  ;;  %v661_v5 = vadd.f32 %v660_v61, %v659_v57 }
 0x3a9   : > { %v520_v7 = vrot.slane %v519_v63, 1  ;;  %v662_v10 = vrot.slane %v661_v5, 2 }
 0x3ab   : > { %v521_v9 = vadd.f32 %v520_v7, %v519_v63  ;;  %v663_v12 = vadd.f32 %v662_v10, %v661_v5 }
 0x3ac   : > { %v649_v11 = vpop.xlane.xlu0 %648 }
 0x3ad   : > { %v650_v4 = vrot.slane %v649_v11, 4  ;;  %797 = vpush %v521_v9  ;;  %v664_v17 = vrot.slane %v663_v12, 1 }
 0x3ae   : > { %799 = vpush %v532_v2 }
 0x3af   : > { %v651_v14 = vadd.f32 %v650_v4, %v649_v11  ;;  %801 = vpush %v644_v13  ;;  %v665_v37 = vadd.f32 %v664_v17, %v663_v12 }
 0x3b1   : > { %v652_v15 = vrot.slane %v651_v14, 2 }
 0x3b3   : > { %v653_v16 = vadd.f32 %v652_v15, %v651_v14 }
 0x3b5   : > { %v654_v18 = vrot.slane %v653_v16, 1 }
 0x3b7   : > { %v655_v20 = vadd.f32 %v654_v18, %v653_v16 }
 0x3b9   : > { %803 = vpush %v655_v20 }
 0x3ba   : > { %805 = vpush %v665_v37 }
 0x3de   : > { %s798_s12 = spop %797 }
 0x3df   : > { %s800_s13 = spop %799 }
 0x3e0   : > { %s802_s14 = spop %801  ;;  %s534_s17 = sadd.f32 %s800_s13, %s798_s12 }
 0x3e1   : > { %s646_s16 = smul.f32 2.0, %s802_s14 }
 0x3e2   : > { %s536_s25 = ssub.f32 %s534_s17, %s535_s21 }
 0x3e3   : > { %s668_s23 = smul.f32 2.0, %s646_s16 }
 0x3ea   : > { %s804_s20 = spop %803 }
 0x3eb   : > { %s806_s22 = spop %805 }
 0x3ec   : > { %s667_s24 = sadd.f32 %s806_s22, %s804_s20 }
 0x3ee   : > { %s669_s26 = ssub.f32 %s667_s24, %s668_s23 }
 0x3f0   : > { %s670_s27 = sadd.f32 %s669_s26, %s536_s25 }
 0x3f2   : > { %v672_v21 = vstv %s670_s27 }
 0x3f3   : > { %v673_v53 = vadd.f32 %v672_v21, %v671_v19 }
 0x3f5   : > { %675 = vst.msk [vmem:[#allocation4] sm:$0x1] %vm674_vm12, %v673_v53 }
 0x3f6   : > { %866 = shalt.err (!%p863_p12)
}
 0x3f7   : > { %s867_s9 = scalar_lea.hbm %s1056_s5, 16 }
 0x3f8   : > { %p868_p13 = scmp.ne.s32.totalorder %s1056_s5, %s867_s9  ;;  %p873_p2 = scmp.lt.u32.totalorder %s867_s9, %s1056_s5 }
 0x3fa   : > { %p869_p0 = pnand %p868_p13, %p811_p5 }
 0x3fc   : > { %p870_p1 = pneg %p869_p0 }
 0x3fe   : > { %p875_p3 = pnand %p873_p2, %p870_p1 }
 0x400   : > { %878 = shalt.err (!%p875_p3)
}
 0x401   : > { %808 = dma.vmem_to_hbm [thread:$0]  (%p811_p5), %s684_s29, 16, %s1056_s5, [#allocation5]  }
 0x402   : > { %884 = dma.done.wait (%p811_p5), [#allocation5], 16  }
 0x403   : > { %886 = vsyncadd (%p811_p5), [#allocation5], 4294967280 }
 0x404 PF: > { %s16_s18 = sadd.s32 1, %s889_s18  }
 0x405   : > { %p13_p4 = scmp.ge.s32.totalorder %s16_s18, 4  }
 0x407   :  { %15 = sbr.rel (!%p13_p4) target bundleno = 1 (0x1), region = 77 }
 0x40e   :  { %696 = vsyncpa [#allocation5], 1 }
 0x40f   :  { %698 = vsyncpa [#allocation5 + $0x1], 1 }

</bundles_post_ra>
